<compile_context>
chip_gen: v5e
topology: v5e:2x2
jax: 0.10.0
libtpu: 0.0.40
codegen_flags: <defaults>
</compile_context>

<pallas_src>
import functools

import jax
import jax.numpy as jnp
from jax.experimental import pallas as pl
from jax.experimental.pallas import tpu as pltpu

_EPS = 1e-12        # torch.nn.functional.normalize eps
_NEG_INF = -1e30    # finite "minus infinity" for masking / init (avoids inf-inf)


# ---------------------------------------------------------------------------
# Prologue kernel: row-wise L2 normalization (+ optional 1/temperature scale),
# output in bf16 for the MXU.
# ---------------------------------------------------------------------------
def _normalize_kernel(x_ref, o_ref, *, scale):
    x = x_ref[...].astype(jnp.float32)
    ssq = jnp.sum(x * x, axis=-1, keepdims=True)
    # 1/max(||x||, eps)  ==  rsqrt(max(||x||^2, eps^2))   (EUP rsqrt)
    inv_norm = jax.lax.rsqrt(jnp.maximum(ssq, _EPS * _EPS))
    o_ref[...] = (x * (inv_norm * scale)).astype(jnp.bfloat16)


def _normalize_rows_bf16(x, scale, block_rows):
    rows, cols = x.shape
    return pl.pallas_call(
        functools.partial(_normalize_kernel, scale=float(scale)),
        out_shape=jax.ShapeDtypeStruct((rows, cols), jnp.bfloat16),
        grid_spec=pltpu.PrefetchScalarGridSpec(
            num_scalar_prefetch=0,
            grid=(rows // block_rows,),
            in_specs=[pl.BlockSpec((block_rows, cols), lambda i: (i, 0))],
            out_specs=pl.BlockSpec((block_rows, cols), lambda i: (i, 0))),
        compiler_params=pltpu.CompilerParams(dimension_semantics=("parallel",)),
    )(x)


# ---------------------------------------------------------------------------
# Shared online-logsumexp update over one (blk_q, blk_k) logits tile.
# q is already scaled by 1/temperature, so logits come out pre-scaled.
# ---------------------------------------------------------------------------
def _online_lse_update(q, k, j, m_sc, l_sc, *, n_keys, blk_k):
    logits = jax.lax.dot_general(
        q, k, dimension_numbers=(((1,), (1,)), ((), ())),
        preferred_element_type=jnp.float32)                    # (blk_q, blk_k)
    if n_keys % blk_k != 0:  # static: mask padded key rows only when they exist
        col = jax.lax.broadcasted_iota(jnp.int32, (1, blk_k), 1) + j * blk_k
        logits = logits + jnp.where(col < n_keys, 0.0, _NEG_INF)
    m_prev = m_sc[...]
    m_new = jnp.maximum(m_prev, jnp.max(logits, axis=-1, keepdims=True))
    alpha = jnp.exp(m_prev - m_new)
    l_sc[...] = alpha * l_sc[...] + jnp.sum(jnp.exp(logits - m_new),
                                            axis=-1, keepdims=True)
    m_sc[...] = m_new


def _row_dot_f32(a_ref, b_ref):
    return jnp.sum(a_ref[...].astype(jnp.float32) * b_ref[...].astype(jnp.float32),
                   axis=-1, keepdims=True)


# ---------------------------------------------------------------------------
# Kernel 1: negative_keys is None (in-batch negatives, labels = arange(N)).
#   per-row loss_i = logsumexp_j(<qn_i, pn_j>/T) - <qn_i, pn_i>/T
# ---------------------------------------------------------------------------
def _infonce_self_kernel(q_ref, p_ref, k_ref, loss_ref, m_sc, l_sc,
                         *, n_keys, blk_k):
    j = pl.program_id(1)

    @pl.when(j == 0)
    def _init():
        m_sc[...] = jnp.full_like(m_sc, _NEG_INF)
        l_sc[...] = jnp.zeros_like(l_sc)

    _online_lse_update(q_ref[...], k_ref[...], j, m_sc, l_sc,
                       n_keys=n_keys, blk_k=blk_k)

    @pl.when(j == pl.num_programs(1) - 1)
    def _finalize():
        pos = _row_dot_f32(q_ref, p_ref)              # diagonal logit, O(N*D)
        loss_ref[...] = m_sc[...] + jnp.log(l_sc[...]) - pos


# ---------------------------------------------------------------------------
# Kernel 2: unpaired negative_keys (M, D), label = 0 (the positive logit).
#   per-row loss_i = logsumexp([pos_i, neg_i*]/T) - pos_i/T
# ---------------------------------------------------------------------------
def _infonce_unpaired_kernel(q_ref, p_ref, nk_ref, loss_ref, m_sc, l_sc, pos_sc,
                             *, n_keys, blk_k):
    j = pl.program_id(1)

    @pl.when(j == 0)
    def _init():
        pos = _row_dot_f32(q_ref, p_ref)
        pos_sc[...] = pos
        m_sc[...] = pos                    # online lse starts at the positive
        l_sc[...] = jnp.ones_like(l_sc)    # exp(pos - pos) = 1

    _online_lse_update(q_ref[...], nk_ref[...], j, m_sc, l_sc,
                       n_keys=n_keys, blk_k=blk_k)

    @pl.when(j == pl.num_programs(1) - 1)
    def _finalize():
        loss_ref[...] = m_sc[...] + jnp.log(l_sc[...]) - pos_sc[...]


# ---------------------------------------------------------------------------
# Wrapper: validation, padding (layout plumbing), pallas_call setup, reduction.
# ---------------------------------------------------------------------------
def _round_up(x, m):
    return (x + m - 1) // m * m


def _pad_2d(x, rows, cols):
    r, c = x.shape
    if r == rows and c == cols:
        return x
    return jnp.pad(x, ((0, rows - r), (0, cols - c)))


def info_nce_pallas(query, positive_key, negative_keys=None, temperature=0.1,
                    reduction="mean", negative_mode="unpaired"):
    if query.ndim != 2:
        raise ValueError("<query> must have 2 dimensions.")
    if positive_key.ndim != 2:
        raise ValueError("<positive_key> must have 2 dimensions.")
    if query.shape[-1] != positive_key.shape[-1]:
        raise ValueError("query / positive_key feature dims must match.")
    if query.shape[0] != positive_key.shape[0]:
        raise ValueError("query / positive_key must have the same number of rows.")
    if reduction not in ("mean", "sum", "none"):
        raise ValueError("reduction must be one of 'none', 'sum', 'mean'.")
    if negative_keys is not None:
        if negative_mode != "unpaired":
            # TODO(synk): 'paired' negative mode ((N, M, D) batched bmm) not implemented.
            raise NotImplementedError("only negative_mode='unpaired' is implemented")
        if negative_keys.ndim != 2:
            raise ValueError("<negative_keys> must be 2-D for 'unpaired' mode.")
        if negative_keys.shape[-1] != query.shape[-1]:
            raise ValueError("query / negative_keys feature dims must match.")
    # TODO(synk): output='logits' and explicit `labels` of the torch module are not implemented.

    n, d = query.shape
    inv_t = 1.0 / float(temperature)
    d_pad = _round_up(d, 128)                       # feature dim -> lanes

    # Query-row tile ("parallel" grid axis).  16-row granularity keeps bf16
    # sublane tiling happy; 256 rows caps the f32 logits tile at <=512 KiB.
    blk_q = min(256, _round_up(n, 16))
    n_pad = _round_up(n, blk_q)

    if negative_keys is None:
        blk_k = blk_q                               # keys are the positives
        n_keys, k_pad = n, n_pad
    else:
        m = negative_keys.shape[0]
        blk_k = min(512, _round_up(m, 16))
        n_keys, k_pad = m, _round_up(m, blk_k)

    q_p = _pad_2d(query, n_pad, d_pad)
    p_p = _pad_2d(positive_key, n_pad, d_pad)

    # Prologue: normalize once, fold 1/temperature into the query, cast to bf16.
    qn = _normalize_rows_bf16(q_p, inv_t, blk_q)
    pn = _normalize_rows_bf16(p_p, 1.0, blk_q)

    grid = (n_pad // blk_q, k_pad // blk_k)
    q_spec = pl.BlockSpec((blk_q, d_pad), lambda i, j: (i, 0))
    k_spec = pl.BlockSpec((blk_k, d_pad), lambda i, j: (j, 0))
    out_spec = pl.BlockSpec((blk_q, 1), lambda i, j: (i, 0))
    out_shape = jax.ShapeDtypeStruct((n_pad, 1), jnp.float32)
    cparams = pltpu.CompilerParams(dimension_semantics=("parallel", "arbitrary"))
    scratch = [pltpu.VMEM((blk_q, 1), jnp.float32),   # running max m
               pltpu.VMEM((blk_q, 1), jnp.float32)]   # running sum l

    if negative_keys is None:
        kern = functools.partial(_infonce_self_kernel, n_keys=n_keys, blk_k=blk_k)
        row_loss = pl.pallas_call(
            kern,
            out_shape=out_shape,
            grid_spec=pltpu.PrefetchScalarGridSpec(
                num_scalar_prefetch=0, grid=grid,
                in_specs=[q_spec, q_spec, k_spec],
                out_specs=out_spec,
                scratch_shapes=scratch),
            compiler_params=cparams,
        )(qn, pn, pn)
    else:
        nk_p = _pad_2d(negative_keys, k_pad, d_pad)
        nkn = _normalize_rows_bf16(nk_p, 1.0, blk_k)
        kern = functools.partial(_infonce_unpaired_kernel, n_keys=n_keys, blk_k=blk_k)
        row_loss = pl.pallas_call(
            kern,
            out_shape=out_shape,
            grid_spec=pltpu.PrefetchScalarGridSpec(
                num_scalar_prefetch=0, grid=grid,
                in_specs=[q_spec, q_spec, k_spec],
                out_specs=out_spec,
                scratch_shapes=scratch + [pltpu.VMEM((blk_q, 1), jnp.float32)]),
            compiler_params=cparams,
        )(qn, pn, nkn)

    per_row = row_loss[:n, 0]                # drop padded rows (tiny XLA slice)
    if reduction == "mean":
        return jnp.mean(per_row)
    if reduction == "sum":
        return jnp.sum(per_row)
    return per_row


class InfoNCE:
    """Thin functional equivalent of the torch InfoNCE module."""

    def __init__(self, temperature=0.1, reduction="mean", negative_mode="unpaired"):
        self.temperature = temperature
        self.reduction = reduction
        self.negative_mode = negative_mode

    def __call__(self, query, positive_key, negative_keys=None):
        return info_nce_pallas(query, positive_key, negative_keys,
                               temperature=self.temperature,
                               reduction=self.reduction,
                               negative_mode=self.negative_mode)


# -------------------------- pure-JAX references ----------------------------
def _info_nce_ref(query, positive_key, negative_keys=None, temperature=0.1,
                  reduction="mean", cast_bf16=False):
    def l2n(x):
        x = x.astype(jnp.float32)
        ssq = jnp.sum(x * x, axis=-1, keepdims=True)
        return x * jax.lax.rsqrt(jnp.maximum(ssq, _EPS * _EPS))

    qn = l2n(query) * (1.0 / temperature)
    pn = l2n(positive_key)
    nkn = None if negative_keys is None else l2n(negative_keys)
    if cast_bf16:   # emulate the kernel's bf16 MXU operands (f32 accumulation)
        qn = qn.astype(jnp.bfloat16).astype(jnp.float32)
        pn = pn.astype(jnp.bfloat16).astype(jnp.float32)
        if nkn is not None:
            nkn = nkn.astype(jnp.bfloat16).astype(jnp.float32)

    if negative_keys is None:
        logits = qn @ pn.T
        labels = jnp.arange(qn.shape[0])
    else:
        pos = jnp.sum(qn * pn, axis=-1, keepdims=True)
        logits = jnp.concatenate([pos, qn @ nkn.T], axis=1)
        labels = jnp.zeros(qn.shape[0], dtype=jnp.int32)
    lse = jax.nn.logsumexp(logits, axis=-1)
    correct = jnp.take_along_axis(logits, labels[:, None], axis=-1)[:, 0]
    per = lse - correct
    if reduction == "mean":
        return jnp.mean(per)
    if reduction == "sum":
        return jnp.sum(per)
    return per


def _assert_close(got, want, atol, rtol, msg):
    if not jnp.allclose(got, want, atol=atol, rtol=rtol):
        raise AssertionError(f"{msg}: got={got} want={want}")


if __name__ == "__main__":
    key = jax.random.PRNGKey(0)
    k1, k2, k3 = jax.random.split(key, 3)

    def run_checks(N, M, D, tag):
        q = jax.random.normal(k1, (N, D), dtype=jnp.float32)
        p = jax.random.normal(k2, (N, D), dtype=jnp.float32)
        nk = jax.random.normal(k3, (M, D), dtype=jnp.float32)

        # Case 1: no explicit negatives (in-batch negatives).
        loss_self = info_nce_pallas(q, p)
        # Case 2: unpaired negative keys (module default negative_mode).
        loss_neg = info_nce_pallas(q, p, nk)
        jax.block_until_ready((loss_self, loss_neg))

        # exact-path check (bf16-operand reference)
        _assert_close(loss_self, _info_nce_ref(q, p, cast_bf16=True),
                      2e-3, 2e-3, f"{tag} self/bf16")
        _assert_close(loss_neg, _info_nce_ref(q, p, nk, cast_bf16=True),
                      2e-3, 2e-3, f"{tag} unpaired/bf16")
        # sanity vs full-f32 reference (bf16 MXU operands -> loose tolerance)
        _assert_close(loss_self, _info_nce_ref(q, p), 5e-2, 5e-2, f"{tag} self/f32")
        _assert_close(loss_neg, _info_nce_ref(q, p, nk), 5e-2, 5e-2,
                      f"{tag} unpaired/f32")

        # reduction='sum' / 'none' paths (unpaired)
        loss_sum = info_nce_pallas(q, p, nk, reduction="sum")
        loss_none = info_nce_pallas(q, p, nk, reduction="none")
        jax.block_until_ready((loss_sum, loss_none))
        _assert_close(loss_sum, _info_nce_ref(q, p, nk, reduction="sum",
                                              cast_bf16=True),
                      5e-3, 2e-3, f"{tag} sum/bf16")
        assert loss_none.shape == (N,), loss_none.shape

    # Docstring-sized example: batch=32, num_negative=48, embedding=128.
    run_checks(32, 48, 128, "aligned")
    # Ragged shapes exercise the row/feature padding and key-mask paths.
    run_checks(20, 13, 40, "ragged")

    print("KERNEL_OK")
</pallas_src>

<mosaic_0001>
module attributes {stable_mosaic.version = 11 : i64} {
  func.func @_normalize_kernel(%arg0: i32, %arg1: memref<32x128xf32, #tpu.memory_space<vmem>>, %arg2: memref<32x128xbf16, #tpu.memory_space<vmem>>) attributes {dimension_semantics = [#tpu.dimension_semantics<parallel>], iteration_bounds = array<i64: 1>, scalar_prefetch = 0 : i64, scratch_operands = 0 : i64, tpu.core_type = #tpu.core_type<tc>, window_params = [{transform_indices = @transform_0, window_bounds = array<i64: 32, 128>}, {transform_indices = @transform_1, window_bounds = array<i64: 32, 128>}]} {
    %c0 = arith.constant 0 : index
    %c0_0 = arith.constant 0 : index
    %0 = vector.load %arg1[%c0, %c0_0] : memref<32x128xf32, #tpu.memory_space<vmem>>, vector<32x128xf32>
    %1 = arith.mulf %0, %0 : vector<32x128xf32>
    %cst = arith.constant dense<0.000000e+00> : vector<32xf32>
    %2 = vector.multi_reduction <add>, %1, %cst [1] : vector<32x128xf32> to vector<32xf32>
    %3 = vector.shape_cast %2 : vector<32xf32> to vector<32x1xf32>
    %cst_1 = arith.constant 1.000000e-24 : f32
    %4 = vector.broadcast %cst_1 : f32 to vector<32x1xf32>
    %5 = arith.maximumf %3, %4 : vector<32x1xf32>
    %6 = math.rsqrt %5 : vector<32x1xf32>
    %cst_2 = arith.constant 1.000000e+01 : f32
    %7 = vector.broadcast %cst_2 : f32 to vector<32x1xf32>
    %8 = arith.mulf %6, %7 : vector<32x1xf32>
    %9 = vector.broadcast %8 : vector<32x1xf32> to vector<32x128xf32>
    %10 = arith.mulf %0, %9 : vector<32x128xf32>
    %11 = arith.truncf %10 : vector<32x128xf32> to vector<32x128xbf16>
    %c0_3 = arith.constant 0 : index
    %c0_4 = arith.constant 0 : index
    %12 = vector.load %arg2[%c0_3, %c0_4] : memref<32x128xbf16, #tpu.memory_space<vmem>>, vector<32x128xbf16>
    tpu.vector_store %arg2[%c0_3, %c0_4], %11 {strides = array<i32>} : memref<32x128xbf16, #tpu.memory_space<vmem>>, vector<32x128xbf16>,
    return
  }
  func.func @transform_0(%arg0: i32) -> (i32, i32) {
    %c0_i32 = arith.constant 0 : i32
    %c0_i32_0 = arith.constant 0 : i32
    return %arg0, %c0_i32 : i32, i32
  }
  func.func @transform_1(%arg0: i32) -> (i32, i32) {
    %c0_i32 = arith.constant 0 : i32
    %c0_i32_0 = arith.constant 0 : i32
    return %arg0, %c0_i32 : i32, i32
  }
}

</mosaic_0001>

<bundles_post_ra>
// kernel: tpu_custom_call.1
= control target key start
LH: loop header
LB: loop body
LE: loop exit
PB: predicated region body
PF: predicated region fallthrough
CT: control target
= control target key end

     0   :  { %6 = vsyncpa [#allocation3], 0  ;;  %s239_s0 = inlined_call_operand.hbm [shape: f32[32,128], index: 0, kind: input, shape index: {}]   ;;  %s240_s1 = inlined_call_operand.hbm [shape: bf16[32,128], index: 1, kind: output, shape index: {}]  }
   0x1   :  { %7 = vsyncpa [#allocation4], 0  ;;  %s12_s8 = sshll.u32 %s239_s0, 4  ;;  %s197_s9 = smov [#allocation2]   ;;  %s13_s8 = int_to_ptr.hbm [resolvable:$true] %s12_s8 }
   0x2   :  { %s14_s10 = sshll.u32 %s197_s9, 4  ;;  %s198_s11 = smov 128   ;;  %s15_s10 = int_to_ptr.vmem [resolvable:$true] %s14_s10 }
   0x3   :  { %s199_s12 = smov 8  }
   0x4   :  { %20 = dma.hbm_to_vmem [thread:$0]  %s13_s8, 512, %s15_s10, [#allocation3], %s198_s11, %s198_s11, %s199_s12  }
   0x5   :  { %193 = dma.done.wait [#allocation3], 512  }
   0x6   :  { %194 = vsyncadd [#allocation3], 4294966784  ;;  %v216_v0 = vld [vmem:[#allocation2 + $0x10] sm:$0xff]  ;;  %v218_v1 = vld [vmem:[#allocation2] sm:$0xff]  ;;  %s200_s0 = smov [#allocation5]   ;;  %s107_s16 = sshll.u32 %s240_s1, 4  ;;  %s108_s16 = int_to_ptr.hbm [resolvable:$true] %s107_s16 }
   0x7   :  { %v31_v2 = vmul.f32 %v216_v0, %v216_v0  ;;  %v29_v3 = vmul.f32 %v218_v1, %v218_v1  ;;  %v224_v4 = vld [vmem:[#allocation2 + $0x18] sm:$0xff]  ;;  %v226_v5 = vld [vmem:[#allocation2 + $0x8] sm:$0xff]  ;;  %s105_s13 = sshll.u32 %s200_s0, 4  ;;  %s201_s17 = smov 64   ;;  %s106_s13 = int_to_ptr.vmem [resolvable:$true] %s105_s13 }
   0x8   :  { %v32_v6 = vmul.f32 %v224_v4, %v224_v4  ;;  %v30_v7 = vmul.f32 %v226_v5, %v226_v5  ;;  %s202_s18 = smov 4  }
   0x9   :  { %37 = vadd.xlane.f32.xlu1 %v31_v2  ;;  %33 = vadd.xlane.f32.xlu0 %v29_v3 }
  0x11   :  { %39 = vadd.xlane.f32.xlu1 %v32_v6  ;;  %35 = vadd.xlane.f32.xlu0 %v30_v7 }
  0x7c   :  { %v38_v8 = vpop.xlane.xlu1 %37  ;;  %v34_v9 = vpop.xlane.xlu0 %33 }
  0x7d   :  { %v43_v10 = vmax.f32 %v38_v8, 1e-24  ;;  %v41_v11 = vmax.f32 %v34_v9, 1e-24 }
  0x7f   :  { %137 = vrsqrt.f32 %v43_v10  ;;  %vm71_vm2 = vweird.f32 %v43_v10  ;;  %vm51_vm4 = vweird.f32 %v41_v11 }
  0x80   :  { %139 = vrsqrt.f32 %v41_v11 }
  0x84   :  { %v40_v12 = vpop.xlane.xlu1 %39  ;;  %v36_v13 = vpop.xlane.xlu0 %35 }
  0x85   :  { %v138_v14 = vpop.eup %137  ;;  %v44_v15 = vmax.f32 %v40_v12, 1e-24  ;;  %v42_v16 = vmax.f32 %v36_v13, 1e-24 }
  0x86   :  { %v140_v17 = vpop.eup %139  ;;  %v66_v18 = vmul.f32 %v138_v14, %v43_v10  ;;  %vm72_vm0 = vweird.f32 %v138_v14 }
  0x87   :  { %v46_v19 = vmul.f32 %v140_v17, %v41_v11  ;;  %141 = vrsqrt.f32 %v44_v15  ;;  %vm52_vm1 = vweird.f32 %v140_v17  ;;  %vm73_vm3 = vmor %vm71_vm2, %vm72_vm0  ;;  %vm81_vm8 = vweird.f32 %v44_v15 }
  0x88   :  { %v67_v20 = vmul.f32 %v138_v14, %v66_v18  ;;  %143 = vrsqrt.f32 %v42_v16  ;;  %vm53_vm5 = vmor %vm51_vm4, %vm52_vm1  ;;  %vm61_vm10 = vweird.f32 %v42_v16 }
  0x89   :  { %v47_v21 = vmul.f32 %v140_v17, %v46_v19 }
  0x8a   :  { %v68_v22 = vmul.f32 0.5, %v67_v20 }
  0x8b   :  { %v48_v23 = vmul.f32 0.5, %v47_v21 }
  0x8c   :  { %v69_v24 = vsub.f32 1.5, %v68_v22 }
  0x8d   :  { %v142_v25 = vpop.eup %141  ;;  %v49_v26 = vsub.f32 1.5, %v48_v23 }
  0x8e   :  { %v144_v27 = vpop.eup %143  ;;  %v76_v28 = vmul.f32 %v142_v25, %v44_v15  ;;  %v70_v30 = vmul.f32 %v138_v14, %v69_v24  ;;  %vm82_vm6 = vweird.f32 %v142_v25 }
  0x8f   :  { %v56_v29 = vmul.f32 %v144_v27, %v42_v16  ;;  %v50_v32 = vmul.f32 %v140_v17, %v49_v26  ;;  %vm62_vm7 = vweird.f32 %v144_v27  ;;  %vm83_vm9 = vmor %vm81_vm8, %vm82_vm6 }
  0x90   :  { %v77_v31 = vmul.f32 %v142_v25, %v76_v28  ;;  %v74_v36 = vsel %vm73_vm3, %v138_v14, %v70_v30  ;;  %vm63_vm11 = vmor %vm61_vm10, %vm62_vm7 }
  0x91   :  { %v57_v33 = vmul.f32 %v144_v27, %v56_v29  ;;  %v54_v38 = vsel %vm53_vm5, %v140_v17, %v50_v32  ;;  %v87_v41 = vmul.f32 10.0, %v74_v36 }
  0x92   :  { %v78_v34 = vmul.f32 0.5, %v77_v31  ;;  %v85_v43 = vmul.f32 10.0, %v54_v38 }
  0x93   :  { %v58_v35 = vmul.f32 0.5, %v57_v33  ;;  %v91_v48 = vmul.f32 %v87_v41, %v216_v0 }
  0x94   :  { %v79_v37 = vsub.f32 1.5, %v78_v34  ;;  %v89_v50 = vmul.f32 %v85_v43, %v218_v1 }
  0x95   :  { %v59_v39 = vsub.f32 1.5, %v58_v35 }
  0x96   :  { %v80_v40 = vmul.f32 %v142_v25, %v79_v37 }
  0x97   :  { %v60_v42 = vmul.f32 %v144_v27, %v59_v39 }
  0x98   :  { %v84_v44 = vsel %vm83_vm9, %v142_v25, %v80_v40 }
  0x99   :  { %v88_v45 = vmul.f32 10.0, %v84_v44  ;;  %v64_v46 = vsel %vm63_vm11, %v144_v27, %v60_v42 }
  0x9a   :  { %v86_v47 = vmul.f32 10.0, %v64_v46 }
  0x9b   :  { %v92_v49 = vmul.f32 %v88_v45, %v224_v4 }
  0x9c   :  { %v90_v51 = vmul.f32 %v86_v47, %v226_v5 }
  0x9d   :  { %v128_v52 = vpack.c.bf16 %v92_v49, %v91_v48 }
  0x9e   :  { %v123_v53 = vpack.c.bf16 %v90_v51, %v89_v50 }
  0x9f   :  { %130 = vst [vmem:[#allocation5 + $0x8] sm:$0xff] %v128_v52  }
  0xa0   :  { %124 = vst [vmem:[#allocation5] sm:$0xff] %v123_v53  }
  0xa1   :  { %113 = dma.vmem_to_hbm [thread:$0]  %s106_s13, 256, %s108_s16, [#allocation4], %s201_s17, %s201_s17, %s202_s18  }
  0xa2   :  { %195 = dma.done.wait [#allocation4], 256  }
  0xa3   :  { %196 = vsyncadd [#allocation4], 4294967040 }
  0xa4   :  { %118 = vsyncpa [#allocation3], 1 }
  0xa5   :  { %119 = vsyncpa [#allocation4], 1 }

</bundles_post_ra>
